<compile_context>
chip_gen: v7x
topology: tpu7x:2x2x1
jax: 0.10.0
libtpu: 0.0.40
codegen_flags: <defaults>
</compile_context>

<pallas_src>
import functools

import jax
import jax.numpy as jnp
from jax.experimental import pallas as pl
from jax.experimental.pallas import tpu as pltpu


# ---------------------------------------------------------------------------
# patchify: pure layout transform, done once in the wrapper (XLA reshape/transpose).
# Faithful to MAEHOGLoss.patchify, which hard-codes a single channel.
# ---------------------------------------------------------------------------
def _patchify(imgs, patch_size):
    """imgs: (N, 1, H, W) -> (N, L, p*p)."""
    N, C, H, W = imgs.shape
    p = patch_size
    assert H == W and H % p == 0
    assert C == 1, "MAEHOGLoss.patchify reshapes assuming a single channel"
    h = w = H // p
    x = imgs.reshape(N, 1, h, p, w, p)
    x = jnp.transpose(x, (0, 2, 4, 3, 5, 1))  # 'nchpwq -> nhwpqc'
    return x.reshape(N, h * w, p * p)


# ---------------------------------------------------------------------------
# Kernel
# ---------------------------------------------------------------------------
def _mae_hog_kernel(pred_ref, tgt_ref, mask_ref, num_ref, acc_ref, *,
                    block_rows, patch_dim, n_rows, tiles_per_part,
                    norm_pix_loss, uniform):
    part = pl.program_id(0)    # parallel axis (megacore split on v7x)
    step = pl.program_id(1)    # reduction axis

    @pl.when(step == 0)
    def _():
        acc_ref[...] = jnp.zeros_like(acc_ref)

    p = pred_ref[...].astype(jnp.float32)    # (BR, D)
    t = tgt_ref[...].astype(jnp.float32)     # (BR, D)
    m = mask_ref[...].astype(jnp.float32)    # (BR, 1) -> broadcast over lanes

    if norm_pix_loss:
        # torch: mean/var over dim=-1 (var unbiased), target = (t - mean)/sqrt(var + 1e-6)
        mu = jnp.mean(t, axis=-1, keepdims=True)
        var = jnp.sum((t - mu) ** 2, axis=-1, keepdims=True) * (1.0 / max(patch_dim - 1, 1))
        t = (t - mu) * jax.lax.rsqrt(var + 1e-6)

    d = p - t
    w = d * d * m                            # (BR, D) masked squared error

    if uniform:
        # Every tile is full and in-range: unmasked fast path only.
        acc_ref[...] += w
    else:
        tile = part * tiles_per_part + step
        boundary = (tile + 1) * block_rows > n_rows

        @pl.when(jnp.logical_not(boundary))
        def _():
            acc_ref[...] += w

        @pl.when(boundary)
        def _():
            # Partial last tile and/or clamped duplicate tiles: zero rows >= n_rows.
            # jnp.where is a select, so garbage (possibly NaN) pad rows are dropped.
            row0 = tile * block_rows
            gidx = row0 + jax.lax.broadcasted_iota(jnp.int32, (block_rows, 1), 0)
            acc_ref[...] += jnp.where(gidx < n_rows, w, 0.0)

    @pl.when(step == pl.num_programs(1) - 1)
    def _():
        # Single cross-lane reduction per part; mean over D applied once here.
        num_ref[...] = (jnp.sum(acc_ref[...]) * (1.0 / patch_dim)).reshape(1, 1)


# ---------------------------------------------------------------------------
# Wrapper
# ---------------------------------------------------------------------------
def mae_hog_loss_pallas(imgs, pred, mask, *, patch_size, norm_pix_loss=False,
                        vmem_block_bytes=2 * 1024 * 1024, num_parts=2):
    target = _patchify(imgs, patch_size)      # (N, L, D), native dtype (layout only)
    N, L, D = pred.shape
    assert target.shape == (N, L, D), (target.shape, pred.shape)
    assert mask.shape == (N, L)

    R = N * L
    pred2d = pred.reshape(R, D)
    tgt2d = target.reshape(R, D)
    mask2d = mask.reshape(R, 1)

    # Row-tile sizing: large tiles (mem-bound op), budgeted on the lane-padded VMEM
    # footprint (last dim padded to a multiple of 128 lanes inside VMEM).
    padded_lanes = max(128, ((D + 127) // 128) * 128)
    itemsize = max(pred2d.dtype.itemsize, tgt2d.dtype.itemsize)
    row_bytes = padded_lanes * itemsize
    br = max(8, vmem_block_bytes // row_bytes)
    br = max(8, (br // 8) * 8)
    if R <= br:
        br = max(8, ((R + 7) // 8) * 8)

    total_tiles = pl.cdiv(R, br)
    parts = max(1, min(num_parts, total_tiles))   # split only if there is work to split
    tpp = pl.cdiv(total_tiles, parts)
    uniform = (R % br == 0) and (parts * tpp == total_tiles)

    def in_map(c, i):
        # Clamp so we never DMA a fully out-of-range block; duplicated blocks are
        # zeroed in-kernel by the boundary path.
        return (jnp.minimum(c * tpp + i, total_tiles - 1), 0)

    def out_map(c, i):
        return (c, 0)

    kernel = functools.partial(
        _mae_hog_kernel,
        block_rows=br, patch_dim=D, n_rows=R,
        tiles_per_part=tpp, norm_pix_loss=norm_pix_loss, uniform=uniform)

    num = pl.pallas_call(
        kernel,
        out_shape=jax.ShapeDtypeStruct((parts, 1), jnp.float32),
        grid_spec=pltpu.PrefetchScalarGridSpec(
            num_scalar_prefetch=0,
            grid=(parts, tpp),
            in_specs=[pl.BlockSpec((br, D), in_map),
                      pl.BlockSpec((br, D), in_map),
                      pl.BlockSpec((br, 1), in_map)],
            out_specs=pl.BlockSpec((1, 1), out_map),
            scratch_shapes=[pltpu.VMEM((br, D), jnp.float32)]),
        compiler_params=pltpu.CompilerParams(
            dimension_semantics=("parallel", "arbitrary"),
            vmem_limit_bytes=32 * 1024 * 1024),
    )(pred2d, tgt2d, mask2d)

    # Tiny scalar epilogue (fused by XLA): combine parts, mask.sum() denominator, divide.
    den = jnp.sum(mask.astype(jnp.float32))
    return jnp.sum(num) / den


class MAEHOGLoss:
    """JAX/Pallas port of basicsr MAEHOGLoss (forward pass)."""

    def __init__(self, img_size, patch_size, in_chans, embed_dim,
                 norm_pix_loss=False, loss_weight=1.0, reduction='mean'):
        if reduction not in ('none', 'mean', 'sum'):
            raise ValueError(f'Unsupported reduction mode: {reduction}.')
        # loss_weight / reduction are stored but, exactly like the torch forward(),
        # never applied to the returned loss.
        self.loss_weight = loss_weight
        self.reduction = reduction
        self.norm_pix_loss = norm_pix_loss
        self.img_size = img_size
        self.patch_size = patch_size
        self.in_chans = in_chans
        self.embed_dim = embed_dim  # only consumed by PatchEmbed in torch; irrelevant to the loss

    def __call__(self, imgs, pred, mask):
        return mae_hog_loss_pallas(imgs, pred, mask,
                                   patch_size=self.patch_size,
                                   norm_pix_loss=self.norm_pix_loss)

    forward = __call__


# ---------------------------------------------------------------------------
# Pure-JAX reference (for correctness check)
# ---------------------------------------------------------------------------
def _ref_loss(imgs, pred, mask, patch_size, norm_pix_loss):
    target = _patchify(imgs, patch_size).astype(jnp.float32)
    pred = pred.astype(jnp.float32)
    mask = mask.astype(jnp.float32)
    if norm_pix_loss:
        mean = target.mean(axis=-1, keepdims=True)
        var = jnp.var(target, axis=-1, ddof=1, keepdims=True)
        target = (target - mean) / jnp.sqrt(var + 1e-6)
    loss = (pred - target) ** 2
    loss = loss.mean(axis=-1)
    return (loss * mask).sum() / mask.sum()


# ---------------------------------------------------------------------------
# Demo / self-test
# ---------------------------------------------------------------------------
if __name__ == "__main__":
    key = jax.random.PRNGKey(0)
    k1, k2, k3, k4, k5, k6 = jax.random.split(key, 6)

    # --- Config 1: small shapes consistent with the module (in_chans=1, H=W=16, p=4) ---
    N, C, H, W = 2, 1, 16, 16
    p = 4
    L = (H // p) * (W // p)         # 16 patches
    D = p * p * C                   # 16 values per patch

    imgs = jax.random.normal(k1, (N, C, H, W), dtype=jnp.float32)
    pred = jax.random.normal(k2, (N, L, D), dtype=jnp.float32)
    mask = (jax.random.uniform(k3, (N, L)) > 0.5).astype(jnp.float32)
    mask = mask.at[0, 0].set(1.0)   # guarantee mask.sum() > 0

    mod = MAEHOGLoss(img_size=H, patch_size=p, in_chans=C, embed_dim=32,
                     norm_pix_loss=False)
    loss = jax.block_until_ready(mod(imgs, pred, mask))
    ref = _ref_loss(imgs, pred, mask, p, False)
    assert loss.shape == ()
    assert jnp.allclose(loss, ref, rtol=1e-5, atol=1e-5), (loss, ref)

    mod_n = MAEHOGLoss(img_size=H, patch_size=p, in_chans=C, embed_dim=32,
                       norm_pix_loss=True)
    loss_n = jax.block_until_ready(mod_n(imgs, pred, mask))
    ref_n = _ref_loss(imgs, pred, mask, p, True)
    assert jnp.allclose(loss_n, ref_n, rtol=1e-5, atol=1e-4), (loss_n, ref_n)

    # --- Config 2: force multi-tile grid, partial boundary tile and duplicated tile
    #     (small VMEM budget) to exercise the masked path and the 2-way parallel split.
    N2, H2, p2 = 2, 48, 4
    L2 = (H2 // p2) * (H2 // p2)     # 144 patches -> R = 288 rows
    D2 = p2 * p2

    imgs2 = jax.random.normal(k4, (N2, 1, H2, H2), dtype=jnp.float32)
    pred2 = jax.random.normal(k5, (N2, L2, D2), dtype=jnp.float32)
    mask2 = (jax.random.uniform(k6, (N2, L2)) > 0.5).astype(jnp.float32)
    mask2 = mask2.at[0, 0].set(1.0)

    loss2 = jax.block_until_ready(
        mae_hog_loss_pallas(imgs2, pred2, mask2, patch_size=p2,
                            norm_pix_loss=False, vmem_block_bytes=32 * 1024))
    ref2 = _ref_loss(imgs2, pred2, mask2, p2, False)
    assert jnp.allclose(loss2, ref2, rtol=1e-5, atol=1e-5), (loss2, ref2)

    loss2n = jax.block_until_ready(
        mae_hog_loss_pallas(imgs2, pred2, mask2, patch_size=p2,
                            norm_pix_loss=True, vmem_block_bytes=32 * 1024))
    ref2n = _ref_loss(imgs2, pred2, mask2, p2, True)
    assert jnp.allclose(loss2n, ref2n, rtol=1e-5, atol=1e-4), (loss2n, ref2n)

    print("KERNEL_OK")
</pallas_src>

<mosaic_0001>
module attributes {stable_mosaic.version = 11 : i64} {
  func.func @_mae_hog_kernel(%arg0: i32, %arg1: i32, %arg2: memref<32x16xf32, #tpu.memory_space<vmem>>, %arg3: memref<32x16xf32, #tpu.memory_space<vmem>>, %arg4: memref<32x1xf32, #tpu.memory_space<vmem>>, %arg5: memref<1x1xf32, #tpu.memory_space<vmem>>, %arg6: memref<32x16xf32, #tpu.memory_space<vmem>>) attributes {dimension_semantics = [#tpu.dimension_semantics<parallel>, #tpu.dimension_semantics<arbitrary>], iteration_bounds = array<i64: 1, 1>, scalar_prefetch = 0 : i64, scratch_operands = 1 : i64, tpu.core_type = #tpu.core_type<tc>, window_params = [{transform_indices = @transform_0, window_bounds = array<i64: 32, 16>}, {transform_indices = @transform_1, window_bounds = array<i64: 32, 16>}, {transform_indices = @transform_2, window_bounds = array<i64: 32, 1>}, {transform_indices = @transform_3, window_bounds = array<i64: 1, 1>}]} {
    %c0_i32 = arith.constant 0 : i32
    %0 = arith.cmpi eq, %arg1, %c0_i32 : i32
    %1 = arith.extui %0 : i1 to i32
    %c0_i32_0 = arith.constant 0 : i32
    %2 = arith.cmpi ne, %1, %c0_i32_0 : i32
    scf.if %2 {
      %cst = arith.constant 0.000000e+00 : f32
      %16 = vector.broadcast %cst : f32 to vector<32x16xf32>
      %c0_12 = arith.constant 0 : index
      %c0_13 = arith.constant 0 : index
      %17 = vector.load %arg6[%c0_12, %c0_13] : memref<32x16xf32, #tpu.memory_space<vmem>>, vector<32x16xf32>
      tpu.vector_store %arg6[%c0_12, %c0_13], %16 {strides = array<i32>} : memref<32x16xf32, #tpu.memory_space<vmem>>, vector<32x16xf32>,
    } else {
    }
    %c0 = arith.constant 0 : index
    %c0_1 = arith.constant 0 : index
    %3 = vector.load %arg2[%c0, %c0_1] : memref<32x16xf32, #tpu.memory_space<vmem>>, vector<32x16xf32>
    %c0_2 = arith.constant 0 : index
    %c0_3 = arith.constant 0 : index
    %4 = vector.load %arg3[%c0_2, %c0_3] : memref<32x16xf32, #tpu.memory_space<vmem>>, vector<32x16xf32>
    %c0_4 = arith.constant 0 : index
    %c0_5 = arith.constant 0 : index
    %5 = vector.load %arg4[%c0_4, %c0_5] : memref<32x1xf32, #tpu.memory_space<vmem>>, vector<32x1xf32>
    %6 = arith.subf %3, %4 : vector<32x16xf32>
    %7 = arith.mulf %6, %6 : vector<32x16xf32>
    %8 = vector.broadcast %5 : vector<32x1xf32> to vector<32x16xf32>
    %9 = arith.mulf %7, %8 : vector<32x16xf32>
    %c0_6 = arith.constant 0 : index
    %c0_7 = arith.constant 0 : index
    %10 = vector.load %arg6[%c0_6, %c0_7] : memref<32x16xf32, #tpu.memory_space<vmem>>, vector<32x16xf32>
    %11 = arith.addf %10, %9 : vector<32x16xf32>
    %c0_8 = arith.constant 0 : index
    %c0_9 = arith.constant 0 : index
    %12 = vector.load %arg6[%c0_8, %c0_9] : memref<32x16xf32, #tpu.memory_space<vmem>>, vector<32x16xf32>
    tpu.vector_store %arg6[%c0_8, %c0_9], %11 {strides = array<i32>} : memref<32x16xf32, #tpu.memory_space<vmem>>, vector<32x16xf32>,
    %c0_i32_10 = arith.constant 0 : i32
    %13 = arith.cmpi eq, %arg1, %c0_i32_10 : i32
    %14 = arith.extui %13 : i1 to i32
    %c0_i32_11 = arith.constant 0 : i32
    %15 = arith.cmpi ne, %14, %c0_i32_11 : i32
    scf.if %15 {
      %c0_12 = arith.constant 0 : index
      %c0_13 = arith.constant 0 : index
      %16 = vector.load %arg6[%c0_12, %c0_13] : memref<32x16xf32, #tpu.memory_space<vmem>>, vector<32x16xf32>
      %17 = vector.shape_cast %16 : vector<32x16xf32> to vector<1x32x16xf32>
      %cst = arith.constant dense<0.000000e+00> : vector<1xf32>
      %18 = vector.multi_reduction <add>, %17, %cst [1, 2] : vector<1x32x16xf32> to vector<1xf32>
      %19 = vector.shape_cast %18 : vector<1xf32> to vector<1x1x1xf32>
      %20 = vector.extract %19[0, 0, 0] : f32 from vector<1x1x1xf32>
      %cst_14 = arith.constant 6.250000e-02 : f32
      %21 = arith.mulf %20, %cst_14 : f32
      %22 = vector.broadcast %21 : f32 to vector<1x1xf32>
      %c0_15 = arith.constant 0 : index
      %c0_16 = arith.constant 0 : index
      %23 = vector.load %arg5[%c0_15, %c0_16] : memref<1x1xf32, #tpu.memory_space<vmem>>, vector<1x1xf32>
      tpu.vector_store %arg5[%c0_15, %c0_16], %22 {strides = array<i32>} : memref<1x1xf32, #tpu.memory_space<vmem>>, vector<1x1xf32>,
    } else {
    }
    return
  }
  func.func @transform_0(%arg0: i32, %arg1: i32) -> (i32, i32) {
    %c1_i32 = arith.constant 1 : i32
    %0 = arith.muli %arg0, %c1_i32 : i32
    %1 = arith.addi %0, %arg1 : i32
    %c0_i32 = arith.constant 0 : i32
    %2 = arith.minsi %1, %c0_i32 : i32
    %c0_i32_0 = arith.constant 0 : i32
    %c0_i32_1 = arith.constant 0 : i32
    return %2, %c0_i32_0 : i32, i32
  }
  func.func @transform_1(%arg0: i32, %arg1: i32) -> (i32, i32) {
    %c1_i32 = arith.constant 1 : i32
    %0 = arith.muli %arg0, %c1_i32 : i32
    %1 = arith.addi %0, %arg1 : i32
    %c0_i32 = arith.constant 0 : i32
    %2 = arith.minsi %1, %c0_i32 : i32
    %c0_i32_0 = arith.constant 0 : i32
    %c0_i32_1 = arith.constant 0 : i32
    return %2, %c0_i32_0 : i32, i32
  }
  func.func @transform_2(%arg0: i32, %arg1: i32) -> (i32, i32) {
    %c1_i32 = arith.constant 1 : i32
    %0 = arith.muli %arg0, %c1_i32 : i32
    %1 = arith.addi %0, %arg1 : i32
    %c0_i32 = arith.constant 0 : i32
    %2 = arith.minsi %1, %c0_i32 : i32
    %c0_i32_0 = arith.constant 0 : i32
    %c0_i32_1 = arith.constant 0 : i32
    return %2, %c0_i32_0 : i32, i32
  }
  func.func @transform_3(%arg0: i32, %arg1: i32) -> (i32, i32) {
    %c0_i32 = arith.constant 0 : i32
    %c0_i32_0 = arith.constant 0 : i32
    return %arg0, %c0_i32 : i32, i32
  }
}

</mosaic_0001>

<bundles_post_ra>
// kernel: tpu_custom_call.1
= control target key start
LH: loop header
LB: loop body
LE: loop exit
PB: predicated region body
PF: predicated region fallthrough
CT: control target
= control target key end

     0   :  { %vm115_vm0 = vcmask 130048   ;;  %v267_v2 = vmov 0   ;;  %v268_v3 = vmov 0.0   ;;  %s350_s0 = inlined_call_operand.vmem [shape: f32[32,16], index: 0, kind: input, shape index: {}]   ;;  %s351_s1 = inlined_call_operand.vmem [shape: f32[32,16], index: 1, kind: input, shape index: {}]   ;;  %s352_s2 = inlined_call_operand.vmem [shape: f32[32,1], index: 2, kind: input, shape index: {}]   ;;  %s353_s3 = inlined_call_operand.hbm [shape: f32[1,1], index: 3, kind: output, shape index: {}]  }
   0x1   :  { %v130_v0 = vld [vmem:[%s352_s2 + $0x10] sm:$0xff]  ;;  %v128_v1 = vld [vmem:[%s352_s2] sm:$0xff]  ;;  %242 = vset.pattern.permute.xlu1 %v267_v2  ;;  %241 = vset.pattern.permute.xlu0 %v267_v2  ;;  %118 = vst.msk [vmem:[#allocation2 + $0x10] sm:$0xff] %vm115_vm0, %v268_v3  ;;  %116 = vst.msk [vmem:[#allocation2] sm:$0xff] %vm115_vm0, %v268_v3 }
   0x2   :  { %117 = vst.msk [vmem:[#allocation2 + $0x8] sm:$0xff] %vm115_vm0, %v268_v3  ;;  %119 = vst.msk [vmem:[#allocation2 + $0x18] sm:$0xff] %vm115_vm0, %v268_v3  ;;  %152 = vperm.xlu1 %242, %v130_v0   ;;  %142 = vperm.xlu0 %241, %v128_v1   ;;  %v131_v4 = vld [vmem:[%s352_s2 + $0x18] sm:$0xff]  ;;  %v129_v5 = vld [vmem:[%s352_s2 + $0x8] sm:$0xff] }
   0x3   :  { %8 = vsyncpa [#allocation4], 0  ;;  %v122_v6 = vld [vmem:[%s350_s0 + $0x10] sm:$0xff]  ;;  %v120_v8 = vld [vmem:[%s350_s0] sm:$0xff]  ;;  %vm202_vm1 = vcmask 0  }
   0x4   :  { %v126_v7 = vld [vmem:[%s351_s1 + $0x10] sm:$0xff]  ;;  %v124_v9 = vld [vmem:[%s351_s1] sm:$0xff]  ;;  %v123_v12 = vld [vmem:[%s350_s0 + $0x18] sm:$0xff] }
   0x5   :  { %v134_v10 = vsub.f32 %v122_v6, %v126_v7  ;;  %v132_v11 = vsub.f32 %v120_v8, %v124_v9  ;;  %v127_v13 = vld [vmem:[%s351_s1 + $0x18] sm:$0xff]  ;;  %v121_v14 = vld [vmem:[%s350_s0 + $0x8] sm:$0xff]  ;;  %s269_s0 = smov [#allocation3]  }
   0x6   :  { %157 = vperm.xlu1 %242, %v131_v4   ;;  %147 = vperm.xlu0 %241, %v129_v5   ;;  %v125_v15 = vld [vmem:[%s351_s1 + $0x8] sm:$0xff]  ;;  %v135_v18 = vsub.f32 %v123_v12, %v127_v13  ;;  %s210_s1 = sshll.u32 %s269_s0, 4  ;;  %s211_s1 = int_to_ptr.vmem [resolvable:$true] %s210_s1 }
   0x7   :  { %v138_v16 = vmul.f32 %v134_v10, %v134_v10  ;;  %v136_v17 = vmul.f32 %v132_v11, %v132_v11  ;;  %v133_v19 = vsub.f32 %v121_v14, %v125_v15  ;;  %s243_s10 = scalar_lea.vmem %s211_s1, 16  ;;  %s247_s11 = scalar_lea.vmem %s211_s1, 32 }
   0x8   :  { %v166_v21 = vld [vmem:[#allocation2 + $0x10] sm:$0xff]  ;;  %v164_v23 = vld [vmem:[#allocation2] sm:$0xff]  ;;  %v139_v26 = vmul.f32 %v135_v18, %v135_v18  ;;  %p244_p0 = scmp.ne.s32.totalorder %s211_s1, %s243_s10  ;;  %p248_p1 = scmp.lt.s32.totalorder %s211_s1, %s211_s1 }
   0x9   :  { %v137_v27 = vmul.f32 %v133_v19, %v133_v19  ;;  %v167_v31 = vld [vmem:[#allocation2 + $0x18] sm:$0xff]  ;;  %v165_v33 = vld [vmem:[#allocation2 + $0x8] sm:$0xff]  ;;  %p249_p2 = scmp.lt.s32.totalorder %s247_s11, %s243_s10 }
   0xb   :  { %p250_p3 = por %p249_p2, %p248_p1 }
   0xd   :  { %p251_p4 = pnand %p250_p3, %p244_p0 }
  0x81   :  { %v153_v20 = vpop.permute.xlu1 %152  ;;  %v143_v22 = vpop.permute.xlu0 %142 }
  0x82   :  { %v162_v24 = vmul.f32 %v153_v20, %v138_v16  ;;  %v160_v25 = vmul.f32 %v143_v22, %v136_v17 }
  0x84   :  { %v170_v28 = vadd.f32 %v166_v21, %v162_v24  ;;  %v168_v29 = vadd.f32 %v164_v23, %v160_v25 }
  0x85   :  { %v158_v30 = vpop.permute.xlu1 %157  ;;  %v148_v32 = vpop.permute.xlu0 %147 }
  0x86   :  { %175 = vst.msk [vmem:[#allocation2 + $0x10] sm:$0xff] %vm115_vm0, %v170_v28  ;;  %173 = vst.msk [vmem:[#allocation2] sm:$0xff] %vm115_vm0, %v168_v29  ;;  %v163_v34 = vmul.f32 %v158_v30, %v139_v26  ;;  %v161_v35 = vmul.f32 %v148_v32, %v137_v27 }
  0x88   :  { %v171_v36 = vadd.f32 %v167_v31, %v163_v34  ;;  %v169_v37 = vadd.f32 %v165_v33, %v161_v35 }
  0x8a   :  { %176 = vst.msk [vmem:[#allocation2 + $0x18] sm:$0xff] %vm115_vm0, %v171_v36  ;;  %174 = vst.msk [vmem:[#allocation2 + $0x8] sm:$0xff] %vm115_vm0, %v169_v37 }
  0x8d   :  { %v180_v38 = vld [vmem:[#allocation2] sm:$0xff]  ;;  %v182_v40 = vld [vmem:[#allocation2 + $0x10] sm:$0xff] }
  0x8e   :  { %v184_v41 = vsel %vm115_vm0, %v180_v38, 0.0  ;;  %v187_v45 = vsel %vm115_vm0, %v182_v40, 0.0 }
  0x91   :  { %v181_v39 = vld [vmem:[#allocation2 + $0x8] sm:$0xff]  ;;  %v183_v43 = vld [vmem:[#allocation2 + $0x18] sm:$0xff] }
  0x92   :  { %v185_v42 = vsel %vm115_vm0, %v181_v39, 0.0  ;;  %v189_v47 = vsel %vm115_vm0, %v183_v43, 0.0 }
  0x93   :  { %v186_v44 = vadd.f32 %v185_v42, %v184_v41 }
  0x95   :  { %v188_v46 = vadd.f32 %v187_v45, %v186_v44 }
  0x97   :  { %v190_v48 = vadd.f32 %v189_v47, %v188_v46 }
  0x99   :  { %191 = vadd.xlane.f32.xlu0 %v190_v48 }
 0x126   :  { %v192_v49 = vpop.xlane.xlu0 %191 }
 0x127   :  { %v193_v50 = vrot.slane %v192_v49, 4 }
 0x129   :  { %v194_v51 = vadd.f32 %v193_v50, %v192_v49 }
 0x12b   :  { %v195_v52 = vrot.slane %v194_v51, 2 }
 0x12d   :  { %v196_v53 = vadd.f32 %v195_v52, %v194_v51 }
 0x12f   :  { %v197_v54 = vrot.slane %v196_v53, 1 }
 0x131   :  { %v198_v55 = vadd.f32 %v197_v54, %v196_v53 }
 0x133   :  { %236 = vpush %v198_v55 }
 0x164   :  { %s237_s8 = spop %236 }
 0x165   :  { %s200_s9 = smul.f32 0.0625, %s237_s8 }
 0x167   :  { %v201_v56 = vstv %s200_s9 }
 0x168   :  { %203 = vst.msk [vmem:[#allocation3] sm:$0x1] %vm202_vm1, %v201_v56 }
 0x169   :  { %254 = shalt.err (!%p251_p4)
}
 0x16a   :  { %s255_s14 = scalar_lea.hbm %s353_s3, 16 }
 0x16b   :  { %p256_p5 = scmp.ne.s32.totalorder %s353_s3, %s255_s14  ;;  %p259_p6 = scmp.lt.u32.totalorder %s255_s14, %s353_s3 }
 0x16d   :  { %p261_p7 = pnand %p259_p6, %p256_p5 }
 0x16f   :  { %264 = shalt.err (!%p261_p7)
}
 0x170   :  { %213 = dma.vmem_to_hbm [thread:$0]  %s211_s1, 16, %s353_s3, [#allocation4]  }
 0x171   :  { %265 = dma.done.wait [#allocation4], 16  }
 0x172   :  { %266 = vsyncadd [#allocation4], 4294967280 }
 0x173   :  { %217 = vsyncpa [#allocation4], 1 }

</bundles_post_ra>
